<compile_context>
chip_gen: v7x
topology: tpu7x:2x2x1
jax: 0.10.0
libtpu: 0.0.40
codegen_flags: <defaults>
</compile_context>

<pallas_src>
import jax
import jax.numpy as jnp
from jax.experimental import pallas as pl
from jax.experimental.pallas import tpu as pltpu


def _round_up(x, m):
    return ((x + m - 1) // m) * m


def _round_down(x, m):
    return (x // m) * m


def _fused_affine_tanh_kernel(params_ref, x_ref, o_ref):
    # params_ref: (3,) f32 in SMEM = [w0, w1, b]  (folded conv weights)
    # x_ref     : (n_tile, Cin=2, h_tile, W) NCHW block
    # o_ref     : (n_tile, Cout=1, h_tile, W) NCHW block
    w0 = params_ref[0]
    w1 = params_ref[1]
    b = params_ref[2]
    x = x_ref[...]
    # Pure VPU + EUP, dense (h_tile, W) tiles on the last two (sublane, lane) dims.
    o_ref[...] = jnp.tanh(w0 * x[:, 0:1] + w1 * x[:, 1:2] + b)


def model_tanh_forward(x_nchw, w1, b1, w2, b2, *,
                       vmem_block_budget_bytes=12 * 1024 * 1024):
    """Equivalent of Conv2d(2,16,1) -> Conv2d(16,1,1) -> tanh on NCHW input.

    x_nchw : (N, 2, H, W) float32
    w1     : (16, 2)   first 1x1 conv weight (out_channels, in_channels)
    b1     : (16,)
    w2     : (1, 16)   second 1x1 conv weight
    b2     : (1,)
    returns: (N, 1, H, W) float32
    """
    N, Cin, H, W = x_nchw.shape
    Cout = w2.shape[0]
    assert Cin == 2 and Cout == 1, (Cin, Cout)

    # Exact algebraic fold of the two 1x1 convs (no activation in between):
    #   y = W2 (W1 x + b1) + b2 = (W2 W1) x + (W2 b1 + b2)
    w_fold = (w2 @ w1).reshape(Cin).astype(jnp.float32)      # (2,)
    b_fold = (w2 @ b1 + b2).reshape(Cout).astype(jnp.float32)  # (1,)
    params = jnp.concatenate([w_fold, b_fold])                # (3,) -> SMEM

    # ---------------- tiling: block NCHW directly (no reshape) --------------
    # Double-buffered in+out working set per grid step must stay well inside
    # the smallest scoped-VMEM default (16 MiB on v5e; 32 MiB on v6e/v7x).
    bytes_per_h_row = (Cin + Cout) * W * 4          # one H-row of input + output
    rows_budget = max(8, vmem_block_budget_bytes // (2 * bytes_per_h_row))

    if N == 1:
        n_tile = 1
        if H >= 16:
            # Give the single sample >= 2 H-blocks so both v7x TensorCores get
            # work (harmless extra grid step on v5e/v6e). Keep h_tile a
            # multiple of 8 and under the VMEM budget.
            h_tile = min(_round_up(pl.cdiv(H, 2), 8),
                         max(8, _round_down(rows_budget, 8)))
        else:
            h_tile = H                               # block == full dim is legal
    else:
        if rows_budget >= H:
            # Whole sample(s) per block; pack samples to keep blocks multi-MiB,
            # but keep >= 2 grid blocks for megacore when possible.
            h_tile = H
            n_tile = max(1, min(N, rows_budget // max(H, 1)))
            if pl.cdiv(N, n_tile) < 2 and N >= 2:
                n_tile = (N + 1) // 2
        else:
            # Sample too large for one block: tile along H (multiple of 8).
            n_tile = 1
            h_tile = max(8, min(_round_down(rows_budget, 8), _round_down(H, 8)))

    grid = (pl.cdiv(N, n_tile), pl.cdiv(H, h_tile))

    cost = pl.CostEstimate(
        flops=4 * N * H * W,                 # 2 mul + 2 add per pixel
        transcendentals=N * H * W,           # one tanh per pixel
        bytes_accessed=(Cin + Cout) * N * H * W * 4,
    )

    return pl.pallas_call(
        _fused_affine_tanh_kernel,
        out_shape=jax.ShapeDtypeStruct((N, Cout, H, W), jnp.float32),
        grid=grid,
        in_specs=[
            pl.BlockSpec(memory_space=pltpu.MemorySpace.SMEM),            # params
            pl.BlockSpec((n_tile, Cin, h_tile, W), lambda n, h: (n, 0, h, 0)),
        ],
        out_specs=pl.BlockSpec((n_tile, Cout, h_tile, W),
                               lambda n, h: (n, 0, h, 0)),
        compiler_params=pltpu.CompilerParams(
            dimension_semantics=("parallel", "parallel")),
        cost_estimate=cost,
    )(params, x_nchw)


def _init_params(key):
    # Deterministic Kaiming-uniform-style init (matches PyTorch Conv2d default
    # bounds: U(-1/sqrt(fan_in), 1/sqrt(fan_in)) for 1x1 kernels).
    k1, k2, k3, k4 = jax.random.split(key, 4)
    bound1 = 1.0 / jnp.sqrt(2.0)
    w1 = jax.random.uniform(k1, (16, 2), jnp.float32, -bound1, bound1)
    b1 = jax.random.uniform(k2, (16,), jnp.float32, -bound1, bound1)
    bound2 = 1.0 / jnp.sqrt(16.0)
    w2 = jax.random.uniform(k3, (1, 16), jnp.float32, -bound2, bound2)
    b2 = jax.random.uniform(k4, (1,), jnp.float32, -bound2, bound2)
    return w1, b1, w2, b2


def _reference(x, w1, b1, w2, b2):
    h = jnp.einsum("nchw,oc->nohw", x, w1) + b1[None, :, None, None]
    y = jnp.einsum("nchw,oc->nohw", h, w2) + b2[None, :, None, None]
    return jnp.tanh(y)


if __name__ == "__main__":
    key = jax.random.PRNGKey(0)
    k_x, k_x2, k_p = jax.random.split(key, 3)
    w1, b1, w2, b2 = _init_params(k_p)

    # Same shape as the PyTorch reference input (N=1 path: H split into 2 blocks).
    x = jax.random.normal(k_x, (1, 2, 49, 49), dtype=jnp.float32)
    out = jax.block_until_ready(model_tanh_forward(x, w1, b1, w2, b2))
    ref = _reference(x, w1, b1, w2, b2)
    assert out.shape == (1, 1, 49, 49), out.shape
    assert jnp.allclose(out, ref, atol=1e-5, rtol=1e-5)

    # Small batched shape to exercise the sample-packing (N > 1) tiling path.
    x2 = jax.random.normal(k_x2, (4, 2, 32, 32), dtype=jnp.float32)
    out2 = jax.block_until_ready(model_tanh_forward(x2, w1, b1, w2, b2))
    ref2 = _reference(x2, w1, b1, w2, b2)
    assert out2.shape == (4, 1, 32, 32), out2.shape
    assert jnp.allclose(out2, ref2, atol=1e-5, rtol=1e-5)

    print("KERNEL_OK")
</pallas_src>

<mosaic_0001>
module attributes {stable_mosaic.version = 11 : i64} {
  func.func @_fused_affine_tanh_kernel(%arg0: i32, %arg1: i32, %arg2: memref<3xf32, #tpu.memory_space<smem>>, %arg3: memref<1x2x32x49xf32, #tpu.memory_space<vmem>>, %arg4: memref<1x1x32x49xf32, #tpu.memory_space<vmem>>) attributes {dimension_semantics = [#tpu.dimension_semantics<parallel>, #tpu.dimension_semantics<parallel>], iteration_bounds = array<i64: 1, 2>, scalar_prefetch = 0 : i64, scratch_operands = 0 : i64, tpu.core_type = #tpu.core_type<tc>, window_params = [{transform_indices = @transform_0, window_bounds = array<i64: 3>}, {transform_indices = @transform_1, window_bounds = array<i64: 1, 2, 32, 49>}, {transform_indices = @transform_2, window_bounds = array<i64: 1, 1, 32, 49>}]} {
    %c0 = arith.constant 0 : index
    %0 = memref.load %arg2[%c0] : memref<3xf32, #tpu.memory_space<smem>>
    %c1 = arith.constant 1 : index
    %1 = memref.load %arg2[%c1] : memref<3xf32, #tpu.memory_space<smem>>
    %c2 = arith.constant 2 : index
    %2 = memref.load %arg2[%c2] : memref<3xf32, #tpu.memory_space<smem>>
    %c0_0 = arith.constant 0 : index
    %c0_1 = arith.constant 0 : index
    %c0_2 = arith.constant 0 : index
    %c0_3 = arith.constant 0 : index
    %3 = vector.load %arg3[%c0_0, %c0_1, %c0_2, %c0_3] : memref<1x2x32x49xf32, #tpu.memory_space<vmem>>, vector<1x2x32x49xf32>
    %4 = vector.extract_strided_slice %3 {offsets = [0, 0, 0, 0], sizes = [1, 1, 32, 49], strides = [1, 1, 1, 1]} : vector<1x2x32x49xf32> to vector<1x1x32x49xf32>
    %5 = vector.broadcast %0 : f32 to vector<1x1x32x49xf32>
    %6 = arith.mulf %5, %4 : vector<1x1x32x49xf32>
    %7 = vector.extract_strided_slice %3 {offsets = [0, 1, 0, 0], sizes = [1, 1, 32, 49], strides = [1, 1, 1, 1]} : vector<1x2x32x49xf32> to vector<1x1x32x49xf32>
    %8 = vector.broadcast %1 : f32 to vector<1x1x32x49xf32>
    %9 = arith.mulf %8, %7 : vector<1x1x32x49xf32>
    %10 = arith.addf %6, %9 : vector<1x1x32x49xf32>
    %11 = vector.broadcast %2 : f32 to vector<1x1x32x49xf32>
    %12 = arith.addf %10, %11 : vector<1x1x32x49xf32>
    %13 = math.tanh %12 : vector<1x1x32x49xf32>
    %c0_4 = arith.constant 0 : index
    %c0_5 = arith.constant 0 : index
    %c0_6 = arith.constant 0 : index
    %c0_7 = arith.constant 0 : index
    %14 = vector.load %arg4[%c0_4, %c0_5, %c0_6, %c0_7] : memref<1x1x32x49xf32, #tpu.memory_space<vmem>>, vector<1x1x32x49xf32>
    tpu.vector_store %arg4[%c0_4, %c0_5, %c0_6, %c0_7], %13 {strides = array<i32>} : memref<1x1x32x49xf32, #tpu.memory_space<vmem>>, vector<1x1x32x49xf32>,
    return
  }
  func.func @transform_0(%arg0: i32, %arg1: i32) -> i32 {
    %c0_i32 = arith.constant 0 : i32
    %c0_i32_0 = arith.constant 0 : i32
    return %c0_i32 : i32
  }
  func.func @transform_1(%arg0: i32, %arg1: i32) -> (i32, i32, i32, i32) {
    %c0_i32 = arith.constant 0 : i32
    %c0_i32_0 = arith.constant 0 : i32
    %c0_i32_1 = arith.constant 0 : i32
    return %arg0, %c0_i32, %arg1, %c0_i32_0 : i32, i32, i32, i32
  }
  func.func @transform_2(%arg0: i32, %arg1: i32) -> (i32, i32, i32, i32) {
    %c0_i32 = arith.constant 0 : i32
    %c0_i32_0 = arith.constant 0 : i32
    %c0_i32_1 = arith.constant 0 : i32
    return %arg0, %c0_i32, %arg1, %c0_i32_0 : i32, i32, i32, i32
  }
}

</mosaic_0001>

<bundles_post_ra>
// kernel: tpu_custom_call.1
= control target key start
LH: loop header
LB: loop body
LE: loop exit
PB: predicated region body
PF: predicated region fallthrough
CT: control target
= control target key end

     0   :  { %7 = vsyncpa [#allocation3], 0  ;;  %s1108_s9 = smov 0   ;;  %s1110_s10 = smov 0   ;;  %s1308_s0 = inlined_call_operand.vmem [shape: f32[3], index: 0, kind: input, shape index: {}]   ;;  %s1309_s1 = inlined_call_operand.vmem [shape: f32[1,2,49,49], index: 1, kind: input, shape index: {}]   ;;  %s1310_s2 = inlined_call_operand.vmem [shape: f32[1,1,49,49], index: 2, kind: output, shape index: {}]  }
   0x1   :  { %s1112_s11 = smov 0   ;;  %s1114_s12 = smov 0  }
   0x2   :  { %s1116_s13 = smov 0  }
   0x3 LB: > { %s669_s14 = sadd.s32 4294967295, %s1026_s13   ;;  %s22_s15 = sadd.s32 1, %s1022_s12  ;;  %s1026_s13 = sphi %s1116_s13, %s13_s13   ;;  %s1022_s12 = sphi %s1114_s12, %s1325_s12   ;;  %s1018_s11 = sphi %s1112_s11, %s1324_s11   ;;  %s1014_s10 = sphi %s1110_s10, %s1323_s10   ;;  %s1010_s9 = sphi %s1108_s9, %s1322_s9  }
   0x4   : > { %p23_p0 = scmp.ge.s32.totalorder %s22_s15, 2  ;;  %s55_s16 = sadd.s32 1, %s1014_s10 }
   0x5   : > { %p62_p1 = scmp.ne.s32.totalorder %s1014_s10, %s1010_s9  ;;  %p63_p2 = scmp.eq.s32.totalorder %s1026_s13, 0 }
   0x6   : > { %s1327_s15 = smov (%p23_p0, %s22_s15), 0  ;;  %p94_p4 = scmp.eq.s32.totalorder %s669_s14, 1 }
   0x7   : > { %p1141_p3 = por %p63_p2, %p62_p1  ;;  %s51_s18 = ssub.s32 %s1022_s12, %s1327_s15 }
   0x8   : > { %p671_p5 = scmp.ge.s32.totalorder %s1026_s13, 1  ;;  %p53_p6 = scmp.eq.s32.totalorder %s51_s18, 0 }
   0x9   : > { %p1148_p7 = por %p94_p4, %p62_p1  ;;  %p107_p8 = scmp.lt.s32.totalorder %s1026_s13, 3 }
   0xa   : > { %s1154_s20 = scalar_select %p53_p6, %s1014_s10, %s55_s16  }
   0xb   : > { %s1312_s19 = scalar_select %p1148_p7, 1, 0 }
   0xc   : > { %p1156_p9 = pnand %p671_p5, %p107_p8  ;;  %p1160_p10 = scmp.eq.s32.totalorder %s669_s14, 0 }
   0xd   : > { %s120_s25 = sshll.u32 %s1308_s0, 4  ;;  %s121_s25 = int_to_ptr.vmem [resolvable:$true] %s120_s25 }
   0xe   : > { %p722_p11 = pneg %p1156_p9  ;;  %s905_s26 = scalar_lea.vmem %s121_s25, 16 }
   0xf   : > { %p906_p13 = scmp.ne.s32.totalorder %s121_s25, %s905_s26  ;;  %p913_p4 = scmp.lt.s32.totalorder %s121_s25, %s121_s25 }
  0x10   : > { %p723_p12 = pnand %p1160_p10, %p722_p11  ;;  %p914_p5 = scmp.lt.s32.totalorder %s905_s26, %s905_s26 }
  0x12   : > { %p907_p0 = pneg %p723_p12  ;;  %p915_p6 = por %p914_p5, %p913_p4 }
  0x14   : > { %p908_p1 = pnand %p907_p0, %p906_p13 }
  0x16   : > { %p909_p2 = pneg %p908_p1 }
  0x18   : > { %p916_p8 = pnand %p915_p6, %p909_p2 }
  0x1a   : > { %919 = shalt.err (!%p916_p8)
}
  0x1b   : > { %s1092_s27 = smov [#allocation2]   ;;  %p673_p7 = scmp.ge.s32.totalorder %s1026_s13, 2 }
  0x1c   : > { %725 = dma.vmem_to_smem (!%p723_p12), %s121_s25, 16, %s1092_s27, [#allocation3]  }
  0x1d   : > { %127 = sbr.rel (%p673_p7) target bundleno = 92 (0x5c), region = 20 }
  0x24   : > { %130 = sbr.rel (!%p1141_p3) target bundleno = 92 (0x5c), region = 24  ;;  %s132_s28 = sand.u32 (%p1141_p3), 1, %s1014_s10  }
  0x25   : > { %s675_s29 = sshll.u32 (%p1141_p3), %s1022_s12, 2  ;;  %s674_s30 = sshll.u32 (%p1141_p3), %s132_s28, 6 }
  0x26   : > { %s136_s3 = ssub.s32 (%p1141_p3), 7, %s675_s29  ;;  %s712_s4 = sshll.u32 (%p1141_p3), %s1022_s12, 5 }
  0x27   : > { %p137_p11 = scmp.lt.s32.totalorder (%p1141_p3), %s136_s3, 4  ;;  %s1182_s7 = scalar_lea.vmem (%p1141_p3), %s1309_s1, %s712_s4  }
  0x28   : > { %s1185_s14 = scalar_lea.vmem (%p1141_p3), [#allocation4], %s674_s30  }
  0x2b   : > { %s1329_s3 = smov (!%p137_p11, %s136_s3), 4 }
  0x2c   : > { %s676_s8 = sshll.u32 %s1329_s3, 8 }
  0x2d   : > { %p679_p3 = scmp.eq.s32.totalorder %s676_s8, 0 }
  0x2e   : > { %s1188_s16 = sshrl.u32 (!%p679_p3), %s1329_s3, 2 }
  0x2f   : > { %147 = sbr.rel (%p679_p3) target bundleno = 92 (0x5c), region = 28  ;;  %p680_p7 = scmp.le.s32.totalorder (!%p679_p3), %s1188_s16, 0 }
  0x36   : > { %580 = sbr.rel (%p680_p7) target bundleno = 71 (0x47), region = 182  ;;  %s1315_s17 = smov (!%p680_p7), %s1185_s14 }
  0x37   : > { %s1316_s18 = smov (!%p680_p7), %s1182_s7  ;;  %s1197_s23 = smov (!%p680_p7), 0  }
  0x38   : > { %s1199_s24 = smov (!%p680_p7), 0  }
  0x3d LB: >> { %v225_v0 = vld [vmem:[%s1034_s18] sm:$0xff]  ;;  %v227_v1 = vld [vmem:[%s1034_s18 + $0x8] sm:$0xff]  ;;  %v229_v2 = vld [vmem:[%s1034_s18 + $0x10] sm:$0xff]  ;;  %s241_s25 = sadd.s32 1, %s1038_s23  ;;  %s219_s24 = sadd.s32 1, %s1042_s24   ;;  %s1042_s24 = sphi %s1199_s24, %s219_s24   ;;  %s1038_s23 = sphi %s1197_s23, %s1317_s23   ;;  %s1034_s18 = sphi %s1316_s18, %s246_s18   ;;  %s1030_s17 = sphi %s1315_s17, %s247_s17  }
  0x3e   : >> { %226 = vst [vmem:[%s1030_s17] sm:$0xff] %v225_v0  ;;  %228 = vst [vmem:[%s1030_s17 + $0x8] sm:$0xff] %v227_v1  ;;  %v231_v3 = vld [vmem:[%s1034_s18 + $0x18] sm:$0xff]  ;;  %v235_v5 = vld [vmem:[%s1034_s18 + $0x40] sm:$0xff]  ;;  %p242_p12 = scmp.ge.s32.totalorder %s241_s25, %s1188_s16  ;;  %p218_p13 = scmp.ge.s32.totalorder %s219_s24, %s1188_s16 }
  0x3f   : >> { %230 = vst [vmem:[%s1030_s17 + $0x10] sm:$0xff] %v229_v2  ;;  %v233_v4 = vld [vmem:[%s1034_s18 + $0x38] sm:$0xff]  ;;  %232 = vst [vmem:[%s1030_s17 + $0x18] sm:$0xff] %v231_v3  ;;  %v237_v6 = vld [vmem:[%s1034_s18 + $0x48] sm:$0xff] }
  0x40   : >> { %234 = vst [vmem:[%s1030_s17 + $0x20] sm:$0xff] %v233_v4  ;;  %236 = vst [vmem:[%s1030_s17 + $0x28] sm:$0xff] %v235_v5  ;;  %v239_v7 = vld [vmem:[%s1034_s18 + $0x50] sm:$0xff]  ;;  %s1331_s25 = smov (%p242_p12, %s241_s25), 0  ;;  %221 = sbr.rel (!%p218_p13) target bundleno = 61 (0x3d), region = 188 }
  0x41   : >> { %238 = vst [vmem:[%s1030_s17 + $0x30] sm:$0xff] %v237_v6  ;;  %240 = vst [vmem:[%s1030_s17 + $0x38] sm:$0xff] %v239_v7  ;;  %s681_s26 = sshll.u32 %s1331_s25, 5  ;;  %s1317_s23 = smov %s1331_s25 }
  0x42   : >> { %s246_s18 = scalar_lea.vmem %s1182_s7, %s681_s26   ;;  %s247_s17 = scalar_lea.vmem %s1185_s14, %s681_s26 [#allocation4]  }
  0x47 PF: > { %s1218_s27 = sand.u32 3, %s1329_s3   ;;  %s713_s28 = sshll.u32 %s1188_s16, 5 }
  0x48   : > { %s1222_s29 = scalar_lea.vmem %s1182_s7, %s713_s28   ;;  %s254_s30 = scalar_lea.vmem %s1185_s14, %s713_s28 [#allocation4]  }
  0x49   : > { %p686_p0 = scmp.le.s32.totalorder %s1218_s27, 0 }
  0x4a   : > { %s1044_s4 = smov (!%p686_p0), %s254_s30   ;;  %s1048_s5 = smov (!%p686_p0), %s1222_s29  }
  0x4b   : > { %594 = sbr.rel (%p686_p0) target bundleno = 92 (0x5c), region = 193  ;;  %s1052_s6 = smov (!%p686_p0), 0  }
  0x4c   : > { %s1056_s8 = smov (!%p686_p0), 0  }
  0x52 LB: >> { %v264_v8 = vld [vmem:[%s1050_s5] sm:$0xff]  ;;  %v266_v9 = vld [vmem:[%s1050_s5 + $0x38] sm:$0xff]  ;;  %s268_s3 = sadd.s32 1, %s1054_s6  ;;  %s258_s8 = sadd.s32 1, %s1058_s8   ;;  %s1058_s8 = sphi %s1056_s8, %s258_s8   ;;  %s1054_s6 = sphi %s1052_s6, %s1053_s6   ;;  %s1050_s5 = sphi %s1048_s5, %s273_s5   ;;  %s1046_s4 = sphi %s1044_s4, %s274_s4  }
  0x53   : >> { %265 = vst [vmem:[%s1046_s4] sm:$0xff] %v264_v8  ;;  %267 = vst [vmem:[%s1046_s4 + $0x20] sm:$0xff] %v266_v9  ;;  %p269_p1 = scmp.ge.s32.totalorder %s268_s3, %s1218_s27  ;;  %p257_p2 = scmp.ge.s32.totalorder %s258_s8, %s1218_s27 }
  0x55   : >> { %s1333_s3 = smov (%p269_p1, %s268_s3), 0  ;;  %260 = sbr.rel (!%p257_p2) target bundleno = 82 (0x52), region = 199 }
  0x56   : >> { %s687_s7 = sshll.u32 %s1333_s3, 3  ;;  %s1053_s6 = smov %s1333_s3  }
  0x57   : >> { %s273_s5 = scalar_lea.vmem %s1222_s29, %s687_s7   ;;  %s274_s4 = scalar_lea.vmem %s254_s30, %s687_s7 [#allocation4]  }
  0x5c PF: > { %283 = sbr.rel (%p1156_p9) target bundleno = 181 (0xb5), region = 76 }
  0x63   : > { %1005 = dma.done.wait (%p1160_p10), [#allocation3], 16  }
  0x64   : > { %1007 = vsyncadd (%p1160_p10), [#allocation3], 4294967280  ;;  %s290_s14 = sand.u32 1, %s1010_s9  }
  0x65   : > { %s691_s16 = sshll.u32 %s290_s14, 6 }
  0x66   : > { %s292_s17 = scalar_lea.vmem [#allocation4], %s691_s16 }
  0x67   : > { %296 = sfence }
  0x68   : > { %s321_s18 = sld [smem:[#allocation2]]  ;;  %s693_s23 = sld [smem:[#allocation2 + $0x1]]  ;;  %v324_v10 = vld [vmem:[%s292_s17] sm:$0xff]  ;;  %v325_v11 = vld [vmem:[%s292_s17 + $0x8] sm:$0xff]  ;;  %v326_v12 = vld [vmem:[%s292_s17 + $0x10] sm:$0xff]  ;;  %vm355_vm0 = vcmask 400384  }
  0x69   : > { %s694_s24 = sld [smem:[#allocation2 + $0x2]]  ;;  %v328_v13 = vld [vmem:[%s292_s17 + $0x20] sm:$0xff]  ;;  %v329_v14 = vld [vmem:[%s292_s17 + $0x28] sm:$0xff]  ;;  %v330_v15 = vld [vmem:[%s292_s17 + $0x30] sm:$0xff]  ;;  %s692_s21 = sshll.u32 %s290_s14, 5 }
  0x6a   : > { %v327_v17 = vld [vmem:[%s292_s17 + $0x18] sm:$0xff]  ;;  %s1241_s22 = scalar_lea.vmem [#allocation5], %s692_s21   ;;  %p1318_p9 = scmp.ne.s32.totalorder %s1312_s19, 0 }
  0x6b   : > { %v331_v18 = vld [vmem:[%s292_s17 + $0x38] sm:$0xff]  ;;  %s696_s9 = sshll.u32 (%p1318_p9), %s1018_s11, 2  ;;  %s715_s25 = sshll.u32 (%p1318_p9), %s1018_s11, 5 }
  0x6c   : > { %s368_s26 = ssub.s32 (%p1318_p9), 7, %s696_s9  ;;  %s1254_s29 = scalar_lea.vmem (%p1318_p9), %s1310_s2, %s715_s25  }
  0x6d   : > { %p369_p10 = scmp.lt.s32.totalorder (%p1318_p9), %s368_s26, 4 }
  0x6e   : > { %v332_v16 = vstv %s321_s18  ;;  %v337_v20 = vstv %s693_s23 }
  0x6f   : > { %v333_v19 = vmul.f32 %v332_v16, %v324_v10  ;;  %v334_v21 = vmul.f32 %v332_v16, %v325_v11  ;;  %v335_v22 = vmul.f32 %v332_v16, %v326_v12  ;;  %v338_v23 = vmul.f32 %v337_v20, %v328_v13 }
  0x70   : > { %v339_v24 = vmul.f32 %v337_v20, %v329_v14  ;;  %v340_v25 = vmul.f32 %v337_v20, %v330_v15  ;;  %v346_v26 = vstv %s694_s24  ;;  %v336_v27 = vmul.f32 %v332_v16, %v327_v17 }
  0x71   : > { %v341_v28 = vmul.f32 %v337_v20, %v331_v18  ;;  %v342_v29 = vadd.f32 %v338_v23, %v333_v19 }
  0x72   : > { %v343_v30 = vadd.f32 %v339_v24, %v334_v21  ;;  %v344_v31 = vadd.f32 %v340_v25, %v335_v22 }
  0x73   : > { %v345_v32 = vadd.f32 %v341_v28, %v336_v27  ;;  %v347_v33 = vadd.f32 %v346_v26, %v342_v29 }
  0x74   : > { %v348_v34 = vadd.f32 %v346_v26, %v343_v30  ;;  %v349_v35 = vadd.f32 %v346_v26, %v344_v31 }
  0x75   : > { %v350_v36 = vadd.f32 %v346_v26, %v345_v32  ;;  %897 = vtanh.f32 %v347_v33 }
  0x76   : > { %899 = vtanh.f32 %v348_v34 }
  0x77   : > { %901 = vtanh.f32 %v349_v35 }
  0x78   : > { %903 = vtanh.f32 %v350_v36 }
  0x7d   : > { %366 = sbr.rel (!%p1318_p9) target bundleno = 181 (0xb5), region = 88 }
  0x7f   : > { %v898_v37 = vpop.eup %897 }
  0x80   : > { %v900_v38 = vpop.eup %899  ;;  %356 = vst.msk [vmem:[%s1241_s22] sm:$0xff] %vm355_vm0, %v898_v37 }
  0x81   : > { %v902_v39 = vpop.eup %901  ;;  %357 = vst.msk [vmem:[%s1241_s22 + $0x8] sm:$0xff] %vm355_vm0, %v900_v38 }
  0x82   : > { %v904_v40 = vpop.eup %903  ;;  %358 = vst.msk [vmem:[%s1241_s22 + $0x10] sm:$0xff] %vm355_vm0, %v902_v39 }
  0x83   : > { %359 = vst.msk [vmem:[%s1241_s22 + $0x18] sm:$0xff] %vm355_vm0, %v904_v40 }
  0x84   : > { %s1335_s26 = smov (!%p369_p10, %s368_s26), 4 }
  0x85   : > { %s697_s30 = sshll.u32 %s1335_s26, 7 }
  0x86   : > { %p700_p4 = scmp.eq.s32.totalorder %s697_s30, 0 }
  0x87   : > { %s1260_s19 = sshrl.u32 (!%p700_p4), %s1335_s26, 2 }
  0x88   : > { %379 = sbr.rel (%p700_p4) target bundleno = 181 (0xb5), region = 92  ;;  %p701_p5 = scmp.le.s32.totalorder (!%p700_p4), %s1260_s19, 0 }
  0x8f   : > { %608 = sbr.rel (%p701_p5) target bundleno = 160 (0xa0), region = 204  ;;  %s1319_s11 = smov (!%p701_p5), %s1254_s29 }
  0x90   : > { %s1320_s4 = smov (!%p701_p5), %s1241_s22  ;;  %s1269_s5 = smov (!%p701_p5), 0  }
  0x91   : > { %s1072_s6 = smov (!%p701_p5), 0  }
  0x96 LB: >> { %v447_v41 = vld [vmem:[%s1066_s4] sm:$0xff]  ;;  %v449_v42 = vld [vmem:[%s1066_s4 + $0x8] sm:$0xff]  ;;  %v451_v43 = vld [vmem:[%s1066_s4 + $0x10] sm:$0xff]  ;;  %s455_s8 = sadd.s32 1, %s1070_s5  ;;  %s441_s6 = sadd.s32 1, %s1074_s6   ;;  %s1074_s6 = sphi %s1072_s6, %s441_s6   ;;  %s1070_s5 = sphi %s1269_s5, %s1321_s5   ;;  %s1066_s4 = sphi %s1320_s4, %s460_s4   ;;  %s1062_s11 = sphi %s1319_s11, %s461_s11  }
  0x97   : >> { %448 = vst [vmem:[%s1062_s11] sm:$0xff] %v447_v41  ;;  %450 = vst [vmem:[%s1062_s11 + $0x8] sm:$0xff] %v449_v42  ;;  %v453_v44 = vld [vmem:[%s1066_s4 + $0x18] sm:$0xff]  ;;  %p456_p6 = scmp.ge.s32.totalorder %s455_s8, %s1260_s19  ;;  %p440_p8 = scmp.ge.s32.totalorder %s441_s6, %s1260_s19 }
  0x98   : >> { %452 = vst [vmem:[%s1062_s11 + $0x10] sm:$0xff] %v451_v43  ;;  %454 = vst [vmem:[%s1062_s11 + $0x18] sm:$0xff] %v453_v44 }
  0x99   : >> { %s1337_s8 = smov (%p456_p6, %s455_s8), 0  ;;  %443 = sbr.rel (!%p440_p8) target bundleno = 150 (0x96), region = 210 }
  0x9a   : >> { %s702_s3 = sshll.u32 %s1337_s8, 5  ;;  %s1321_s5 = smov %s1337_s8 }
  0x9b   : >> { %s460_s4 = scalar_lea.vmem %s1241_s22, %s702_s3 [#allocation5]   ;;  %s461_s11 = scalar_lea.vmem %s1254_s29, %s702_s3  }
  0xa0 PF: > { %s1285_s7 = sand.u32 3, %s1335_s26   ;;  %s716_s14 = sshll.u32 %s1260_s19, 5 }
  0xa1   : > { %s466_s16 = scalar_lea.vmem %s1241_s22, %s716_s14 [#allocation5]   ;;  %s468_s17 = scalar_lea.vmem %s1254_s29, %s716_s14  }
  0xa2   : > { %p707_p11 = scmp.le.s32.totalorder %s1285_s7, 0 }
  0xa3   : > { %s1076_s18 = smov (!%p707_p11), %s468_s17   ;;  %s1080_s23 = smov (!%p707_p11), %s466_s16  }
  0xa4   : > { %622 = sbr.rel (%p707_p11) target bundleno = 181 (0xb5), region = 215  ;;  %s1084_s24 = smov (!%p707_p11), 0  }
  0xa5   : > { %s1088_s21 = smov (!%p707_p11), 0  }
  0xab LB: >> { %v478_v45 = vld [vmem:[%s1082_s23] sm:$0xff]  ;;  %s480_s9 = sadd.s32 1, %s1086_s24  ;;  %s472_s21 = sadd.s32 1, %s1090_s21   ;;  %s1090_s21 = sphi %s1088_s21, %s472_s21   ;;  %s1086_s24 = sphi %s1084_s24, %s1085_s24   ;;  %s1082_s23 = sphi %s1080_s23, %s485_s23   ;;  %s1078_s18 = sphi %s1076_s18, %s486_s18  }
  0xac   : >> { %479 = vst [vmem:[%s1078_s18] sm:$0xff] %v478_v45  ;;  %p481_p3 = scmp.ge.s32.totalorder %s480_s9, %s1285_s7  ;;  %p471_p7 = scmp.ge.s32.totalorder %s472_s21, %s1285_s7 }
  0xae   : >> { %s1339_s9 = smov (%p481_p3, %s480_s9), 0  ;;  %474 = sbr.rel (!%p471_p7) target bundleno = 171 (0xab), region = 221 }
  0xaf   : >> { %s708_s22 = sshll.u32 %s1339_s9, 3  ;;  %s1085_s24 = smov %s1339_s9  }
  0xb0   : >> { %s485_s23 = scalar_lea.vmem %s466_s16, %s708_s22 [#allocation5]   ;;  %s486_s18 = scalar_lea.vmem %s468_s17, %s708_s22  }
  0xb5 PF: > { %s13_s13 = sadd.s32 1, %s1026_s13   ;;  %s1322_s9 = smov %s1014_s10 }
  0xb6   : > { %p10_p12 = scmp.ge.s32.totalorder %s13_s13, 4   ;;  %s1323_s10 = smov %s1154_s20 }
  0xb7   : > { %s1324_s11 = smov %s1022_s12  ;;  %s1325_s12 = smov %s1327_s15 }
  0xb8   :  { %12 = sbr.rel (!%p10_p12) target bundleno = 3 (0x3), region = 232 }
  0xbf   :  { %502 = vsyncpa [#allocation3], 1 }
  0xc0   :  { %504 = vsyncpa [#allocation3 + $0x1], 1 }

</bundles_post_ra>
